<compile_context>
chip_gen: v7x
topology: tpu7x:2x2x1
jax: 0.10.0
libtpu: 0.0.40
codegen_flags: <defaults>
</compile_context>

<pallas_src>
import functools

import jax
import jax.numpy as jnp
from jax.experimental import pallas as pl
from jax.experimental.pallas import tpu as pltpu


def _se_kernel(x_ref, w1t_ref, b1_ref, w2t_ref, b2_ref, o_ref, *, hw_true):
    # x_ref:  (Nb, C, HWp)      w1t_ref: (C, Cr)   b1_ref: (1, Cr)
    # w2t_ref:(Cr, C)           b2_ref:  (1, C)    o_ref:  (Nb, C, HWp)
    x = x_ref[...].astype(jnp.float32)                      # (Nb, C, HWp)

    # Squeeze: global average pool over the (padded) spatial lane axis.
    # Padded lanes are zero, so sum / true_HW gives the exact mean.
    s = jnp.sum(x, axis=2) * (1.0 / hw_true)                # (Nb, C) f32

    # Excite: 1x1 conv -> ReLU -> 1x1 conv -> hsigmoid (all on the pooled slab).
    h = jnp.dot(s, w1t_ref[...], preferred_element_type=jnp.float32) + b1_ref[...]
    h = jnp.maximum(h, 0.0)                                 # (Nb, Cr)
    g = jnp.dot(h, w2t_ref[...], preferred_element_type=jnp.float32) + b2_ref[...]
    g = jnp.clip(g + 3.0, 0.0, 6.0) * (1.0 / 6.0)           # hsigmoid, (Nb, C)

    # Scale: broadcast gate over the spatial axis.
    o_ref[...] = (x * g[:, :, None]).astype(o_ref.dtype)


def se_module(x_nchw, w1, b1, w2, b2, *, vmem_budget_bytes=24 << 20):
    """x_nchw: (N, C, H, W). w1: (Cr, C), b1: (Cr,), w2: (C, Cr), b2: (C,)."""
    N, C, H, W = x_nchw.shape
    Cr = w1.shape[0]
    HW = H * W
    HWp = ((HW + 127) // 128) * 128          # lane-dense last block dim
    itemsize = jnp.dtype(x_nchw.dtype).itemsize

    # Per-sample VMEM cost of the data blocks: 2 buffers x (in + out).
    per_sample = 4 * C * HWp * itemsize
    Nb = max(1, min(N, vmem_budget_bytes // per_sample))
    Np = ((N + Nb - 1) // Nb) * Nb           # pad batch to a multiple of Nb

    x = x_nchw.reshape(N, C, HW)
    if (Np - N) or (HWp - HW):
        x = jnp.pad(x, ((0, Np - N), (0, 0), (0, HWp - HW)))

    w1t = jnp.transpose(w1)                  # (C, Cr)
    w2t = jnp.transpose(w2)                  # (Cr, C)
    b1r = b1.reshape(1, Cr)                  # lane-major biases
    b2r = b2.reshape(1, C)

    # Advisory cost: two tiny matmuls + pool + scale; traffic = read x + write out.
    flops = N * (4 * C * Cr + 2 * C * HW)
    bytes_accessed = 2 * N * C * HW * itemsize + (2 * C * Cr + C + Cr) * 4

    kernel = functools.partial(_se_kernel, hw_true=float(HW))
    grid = (Np // Nb,)

    out = pl.pallas_call(
        kernel,
        out_shape=jax.ShapeDtypeStruct((Np, C, HWp), x.dtype),
        grid_spec=pltpu.PrefetchScalarGridSpec(
            num_scalar_prefetch=0,
            grid=grid,
            in_specs=[
                pl.BlockSpec((Nb, C, HWp), lambda n: (n, 0, 0)),
                pl.BlockSpec((C, Cr), lambda n: (0, 0)),
                pl.BlockSpec((1, Cr), lambda n: (0, 0)),
                pl.BlockSpec((Cr, C), lambda n: (0, 0)),
                pl.BlockSpec((1, C), lambda n: (0, 0)),
            ],
            out_specs=pl.BlockSpec((Nb, C, HWp), lambda n: (n, 0, 0)),
        ),
        compiler_params=pltpu.CompilerParams(
            # Batch-tile axis is independent -> megacore can shard it (v7x 2 TCs).
            dimension_semantics=("parallel",),
            # Above v5e's 16 MiB default scoped limit; within v7x's 32 MiB default.
            vmem_limit_bytes=32 << 20,
        ),
        cost_estimate=pl.CostEstimate(
            flops=flops, transcendentals=0, bytes_accessed=bytes_accessed),
        # Each block is fully read before it is written -> safe to reuse x's buffer.
        input_output_aliases={0: 0},
    )(x, w1t, b1r, w2t, b2r)

    out = out[:N, :, :HW]
    return out.reshape(N, C, H, W)


def se_module_ref(x, w1, b1, w2, b2):
    """Pure-JAX reference for correctness check."""
    s = jnp.mean(x, axis=(2, 3))                          # (N, C)
    h = jnp.maximum(s @ w1.T + b1, 0.0)                   # (N, Cr)
    g = h @ w2.T + b2                                     # (N, C)
    g = jnp.clip(g + 3.0, 0.0, 6.0) / 6.0
    return x * g[:, :, None, None]


def _run_case(N, C, H, W, reduction, seed, **kw):
    Cr = C // reduction
    key = jax.random.PRNGKey(seed)
    kx, k1, k2, k3, k4 = jax.random.split(key, 5)
    x = jax.random.normal(kx, (N, C, H, W), dtype=jnp.float32)
    w1 = jax.random.normal(k1, (Cr, C), dtype=jnp.float32) * 0.1
    b1 = jax.random.normal(k2, (Cr,), dtype=jnp.float32) * 0.1
    w2 = jax.random.normal(k3, (C, Cr), dtype=jnp.float32) * 0.1
    b2 = jax.random.normal(k4, (C,), dtype=jnp.float32) * 0.1

    out = jax.block_until_ready(se_module(x, w1, b1, w2, b2, **kw))
    ref = se_module_ref(x, w1, b1, w2, b2)
    assert out.shape == (N, C, H, W)
    assert jnp.allclose(out, ref, atol=1e-5, rtol=1e-5), "mismatch vs reference"


if __name__ == "__main__":
    # Case 1: channel=8, reduction=4, 16x16 spatial (HW=256, already lane-dense).
    _run_case(2, 8, 16, 16, 4, seed=0)
    # Case 2: 7x7 spatial (HW=49 -> padded to 128) with a tiny VMEM budget to
    # force Nb=2 and exercise the batch-padding path (N=3 -> Np=4).
    _run_case(3, 8, 7, 7, 4, seed=0, vmem_budget_bytes=32 * 1024)
    print("KERNEL_OK")
</pallas_src>

<mosaic_0001>
module attributes {stable_mosaic.version = 11 : i64} {
  func.func @_se_kernel(%arg0: i32, %arg1: memref<2x8x256xf32, #tpu.memory_space<vmem>>, %arg2: memref<8x2xf32, #tpu.memory_space<vmem>>, %arg3: memref<1x2xf32, #tpu.memory_space<vmem>>, %arg4: memref<2x8xf32, #tpu.memory_space<vmem>>, %arg5: memref<1x8xf32, #tpu.memory_space<vmem>>, %arg6: memref<2x8x256xf32, #tpu.memory_space<vmem>>) attributes {dimension_semantics = [#tpu.dimension_semantics<parallel>], iteration_bounds = array<i64: 1>, scalar_prefetch = 0 : i64, scratch_operands = 0 : i64, tpu.core_type = #tpu.core_type<tc>, window_params = [{transform_indices = @transform_0, window_bounds = array<i64: 2, 8, 256>}, {pipeline_mode = #tpu.pipeline_mode<synchronous>, transform_indices = @transform_1, window_bounds = array<i64: 8, 2>}, {pipeline_mode = #tpu.pipeline_mode<synchronous>, transform_indices = @transform_2, window_bounds = array<i64: 1, 2>}, {pipeline_mode = #tpu.pipeline_mode<synchronous>, transform_indices = @transform_3, window_bounds = array<i64: 2, 8>}, {pipeline_mode = #tpu.pipeline_mode<synchronous>, transform_indices = @transform_4, window_bounds = array<i64: 1, 8>}, {transform_indices = @transform_5, window_bounds = array<i64: 2, 8, 256>}]} {
    %c0 = arith.constant 0 : index
    %c0_0 = arith.constant 0 : index
    %c0_1 = arith.constant 0 : index
    %0 = vector.load %arg1[%c0, %c0_0, %c0_1] : memref<2x8x256xf32, #tpu.memory_space<vmem>>, vector<2x8x256xf32>
    %cst = arith.constant dense<0.000000e+00> : vector<2x8xf32>
    %1 = vector.multi_reduction <add>, %0, %cst [2] : vector<2x8x256xf32> to vector<2x8xf32>
    %cst_2 = arith.constant 3.906250e-03 : f32
    %2 = vector.broadcast %cst_2 : f32 to vector<2x8xf32>
    %3 = arith.mulf %1, %2 : vector<2x8xf32>
    %c0_3 = arith.constant 0 : index
    %c0_4 = arith.constant 0 : index
    %4 = vector.load %arg2[%c0_3, %c0_4] : memref<8x2xf32, #tpu.memory_space<vmem>>, vector<8x2xf32>
    %cst_5 = arith.constant dense<0.000000e+00> : vector<2x2xf32>
    %5 = tpu.matmul %3, %4, %cst_5 {dimension_numbers = #tpu.dot_dimension_numbers<[1], [0], [0], [1], [0, 0, 1, 1], [], []>} : vector<2x8xf32>, vector<8x2xf32>, vector<2x2xf32> -> vector<2x2xf32>
    %c0_6 = arith.constant 0 : index
    %c0_7 = arith.constant 0 : index
    %6 = vector.load %arg3[%c0_6, %c0_7] : memref<1x2xf32, #tpu.memory_space<vmem>>, vector<1x2xf32>
    %7 = vector.broadcast %6 : vector<1x2xf32> to vector<2x2xf32>
    %8 = arith.addf %5, %7 : vector<2x2xf32>
    %cst_8 = arith.constant 0.000000e+00 : f32
    %9 = vector.broadcast %cst_8 : f32 to vector<2x2xf32>
    %10 = arith.maximumf %8, %9 : vector<2x2xf32>
    %c0_9 = arith.constant 0 : index
    %c0_10 = arith.constant 0 : index
    %11 = vector.load %arg4[%c0_9, %c0_10] : memref<2x8xf32, #tpu.memory_space<vmem>>, vector<2x8xf32>
    %cst_11 = arith.constant dense<0.000000e+00> : vector<2x8xf32>
    %12 = tpu.matmul %10, %11, %cst_11 {dimension_numbers = #tpu.dot_dimension_numbers<[1], [0], [0], [1], [0, 0, 1, 1], [], []>} : vector<2x2xf32>, vector<2x8xf32>, vector<2x8xf32> -> vector<2x8xf32>
    %c0_12 = arith.constant 0 : index
    %c0_13 = arith.constant 0 : index
    %13 = vector.load %arg5[%c0_12, %c0_13] : memref<1x8xf32, #tpu.memory_space<vmem>>, vector<1x8xf32>
    %14 = vector.broadcast %13 : vector<1x8xf32> to vector<2x8xf32>
    %15 = arith.addf %12, %14 : vector<2x8xf32>
    %cst_14 = arith.constant 3.000000e+00 : f32
    %16 = vector.broadcast %cst_14 : f32 to vector<2x8xf32>
    %17 = arith.addf %15, %16 : vector<2x8xf32>
    %cst_15 = arith.constant 0.000000e+00 : f32
    %cst_16 = arith.constant 6.000000e+00 : f32
    %18 = vector.broadcast %cst_15 : f32 to vector<2x8xf32>
    %19 = arith.maximumf %18, %17 : vector<2x8xf32>
    %20 = vector.broadcast %cst_16 : f32 to vector<2x8xf32>
    %21 = arith.minimumf %20, %19 : vector<2x8xf32>
    %cst_17 = arith.constant 0.166666672 : f32
    %22 = vector.broadcast %cst_17 : f32 to vector<2x8xf32>
    %23 = arith.mulf %21, %22 : vector<2x8xf32>
    %24 = vector.shape_cast %23 : vector<2x8xf32> to vector<2x8x1xf32>
    %25 = vector.broadcast %24 : vector<2x8x1xf32> to vector<2x8x256xf32>
    %26 = arith.mulf %0, %25 : vector<2x8x256xf32>
    %c0_18 = arith.constant 0 : index
    %c0_19 = arith.constant 0 : index
    %c0_20 = arith.constant 0 : index
    %27 = vector.load %arg6[%c0_18, %c0_19, %c0_20] : memref<2x8x256xf32, #tpu.memory_space<vmem>>, vector<2x8x256xf32>
    tpu.vector_store %arg6[%c0_18, %c0_19, %c0_20], %26 {strides = array<i32>} : memref<2x8x256xf32, #tpu.memory_space<vmem>>, vector<2x8x256xf32>,
    return
  }
  func.func @transform_0(%arg0: i32) -> (i32, i32, i32) {
    %c0_i32 = arith.constant 0 : i32
    %c0_i32_0 = arith.constant 0 : i32
    %c0_i32_1 = arith.constant 0 : i32
    return %arg0, %c0_i32, %c0_i32_0 : i32, i32, i32
  }
  func.func @transform_1(%arg0: i32) -> (i32, i32) {
    %c0_i32 = arith.constant 0 : i32
    %c0_i32_0 = arith.constant 0 : i32
    %c0_i32_1 = arith.constant 0 : i32
    return %c0_i32, %c0_i32_0 : i32, i32
  }
  func.func @transform_2(%arg0: i32) -> (i32, i32) {
    %c0_i32 = arith.constant 0 : i32
    %c0_i32_0 = arith.constant 0 : i32
    %c0_i32_1 = arith.constant 0 : i32
    return %c0_i32, %c0_i32_0 : i32, i32
  }
  func.func @transform_3(%arg0: i32) -> (i32, i32) {
    %c0_i32 = arith.constant 0 : i32
    %c0_i32_0 = arith.constant 0 : i32
    %c0_i32_1 = arith.constant 0 : i32
    return %c0_i32, %c0_i32_0 : i32, i32
  }
  func.func @transform_4(%arg0: i32) -> (i32, i32) {
    %c0_i32 = arith.constant 0 : i32
    %c0_i32_0 = arith.constant 0 : i32
    %c0_i32_1 = arith.constant 0 : i32
    return %c0_i32, %c0_i32_0 : i32, i32
  }
  func.func @transform_5(%arg0: i32) -> (i32, i32, i32) {
    %c0_i32 = arith.constant 0 : i32
    %c0_i32_0 = arith.constant 0 : i32
    %c0_i32_1 = arith.constant 0 : i32
    return %arg0, %c0_i32, %c0_i32_0 : i32, i32, i32
  }
}

</mosaic_0001>

<bundles_post_ra>
// kernel: tpu_custom_call.1
= control target key start
LH: loop header
LB: loop body
LE: loop exit
PB: predicated region body
PF: predicated region fallthrough
CT: control target
= control target key end

     0   :  { %10 = vsyncpa [#allocation3], 0  ;;  %s423_s0 = inlined_call_operand.hbm [shape: f32[2,8,256], index: 0, kind: input, shape index: {}, may-alias: {0,5}]   ;;  %s424_s1 = inlined_call_operand.vmem [shape: f32[8,2], index: 1, kind: input, shape index: {}]   ;;  %s425_s2 = inlined_call_operand.vmem [shape: f32[1,2], index: 2, kind: input, shape index: {}]   ;;  %s426_s3 = inlined_call_operand.vmem [shape: f32[2,8], index: 3, kind: input, shape index: {}]   ;;  %s427_s4 = inlined_call_operand.vmem [shape: f32[1,8], index: 4, kind: input, shape index: {}]   ;;  %s428_s5 = inlined_call_operand.hbm [shape: f32[2,8,256], index: 5, kind: output, shape index: {}, may-alias: {0,5}]  }
   0x1   :  { %11 = vsyncpa [#allocation4], 0  ;;  %s345_s18 = smov [#allocation2]   ;;  %s297_s22 = scalar_lea.hbm %s423_s0, 512 }
   0x2   :  { %s17_s19 = sshll.u32 %s345_s18, 4  ;;  %p298_p0 = scmp.ne.s32.totalorder %s423_s0, %s297_s22  ;;  %s18_s19 = int_to_ptr.vmem [resolvable:$true] %s17_s19 }
   0x3   :  { %p301_p1 = scmp.lt.u32.totalorder %s297_s22, %s423_s0 }
   0x5   :  { %p303_p2 = pnand %p301_p1, %p298_p0 }
   0x7   :  { %306 = shalt.err (!%p303_p2)
}
   0x8   :  { %s307_s27 = scalar_lea.vmem %s18_s19, 512  ;;  %p312_p4 = scmp.lt.s32.totalorder %s18_s19, %s18_s19 }
   0x9   :  { %p308_p3 = scmp.ne.s32.totalorder %s18_s19, %s307_s27  ;;  %p313_p5 = scmp.lt.s32.totalorder %s307_s27, %s307_s27 }
   0xb   :  { %p314_p6 = por %p313_p5, %p312_p4 }
   0xd   :  { %p315_p7 = pnand %p314_p6, %p308_p3 }
   0xf   :  { %318 = shalt.err (!%p315_p7)
}
  0x10   :  { %s346_s28 = smov 256   ;;  %s347_s29 = smov 16  }
  0x11   :  { %23 = dma.hbm_to_vmem [thread:$0]  %s423_s0, 512, %s18_s19, [#allocation3], %s346_s28, %s346_s28, %s347_s29  }
  0x12   :  { %341 = dma.done.wait [#allocation3], 512  }
  0x13   :  { %342 = vsyncadd [#allocation3], 4294966784  ;;  %v35_v0 = vld [vmem:[#allocation2] sm:$0xff]  ;;  %v36_v1 = vld [vmem:[#allocation2 + $0x8] sm:$0xff]  ;;  %v348_v7 = vmov 0.0   ;;  %vm349_vm0 = vmmov 0   ;;  %v57_v8 = vlaneseq }
  0x14   :  { %v37_v2 = vld [vmem:[#allocation2 + $0x10] sm:$0xff]  ;;  %v39_v3 = vadd.f32 %v36_v1, %v35_v0  ;;  %v38_v4 = vld [vmem:[#allocation2 + $0x18] sm:$0xff]  ;;  %v47_v6 = vld [vmem:[%s424_s1] sm:$0xff]  ;;  %281 = vmatprep.subr.mxu0 %v348_v7  ;;  %283 = vmatprep.mubr.msk.f32.mxu0 %vm349_vm0, %v348_v7  ;;  %vm67_vm1 = vcmask 1041409   ;;  %vm69_vm2 = vcmask 64512   ;;  %vm155_vm3 = vcmask 1041408  }
  0x15   :  { %v42_v5 = vadd.f32 %v38_v4, %v37_v2  ;;  %282 = vmatpush3.msra.mxu0 %v47_v6  ;;  %286 = vmatprep.subr.mxu1 %v348_v7  ;;  %v58_v9 = vand.u32 127, %v57_v8  ;;  %v60_v10 = vshrl.u32 %v57_v8, 7  ;;  %v143_v19 = vld [vmem:[%s426_s3] sm:$0x3]  ;;  %vm151_vm4 = vcmask 15360  }
  0x16   :  { %40 = vadd.xlane.f32.xlu0 %v39_v3  ;;  %288 = vmatprep.mubr.msk.f32.mxu1 %vm349_vm0, %v348_v7  ;;  %v272_v20 = vld [vmem:[%s425_s2] ss:$0 sm:$0xff]  ;;  %s350_s2 = smov [#allocation5]  }
  0x17   :  { %v61_v12 = vsub.s32 %v58_v9, %v60_v10  ;;  %287 = vmatpush3.msk.msra.mxu1 %vm155_vm3, %v143_v19  ;;  %v274_v25 = vld [vmem:[%s427_s4] ss:$0 sm:$0xff]  ;;  %v235_v32 = vsub.s32 0, %v60_v10  ;;  %v242_v35 = vsub.s32 1, %v60_v10  ;;  %s260_s3 = sshll.u32 %s350_s2, 4  ;;  %s261_s3 = int_to_ptr.vmem [resolvable:$true] %s260_s3 }
  0x18   :  { %s319_s4 = scalar_lea.vmem %s261_s3, 512  ;;  %p324_p9 = scmp.lt.s32.totalorder %s261_s3, %s261_s3 }
  0x19   :  { %p320_p8 = scmp.ne.s32.totalorder %s261_s3, %s319_s4  ;;  %p325_p10 = scmp.lt.s32.totalorder %s319_s4, %s319_s4 }
  0x1a   :  { %43 = vadd.xlane.f32.xlu0 %v42_v5 }
  0x1b   :  { %p326_p11 = por %p325_p10, %p324_p9 }
  0x1d   :  { %p327_p12 = pnand %p326_p11, %p320_p8 }
  0xa3   :  { %v41_v11 = vpop.xlane.xlu0 %40 }
  0xa4   :  { %v45_v13 = vmul.f32 0.00390625, %v41_v11 }
  0xa6   :  { %v62_v16 = vrot.slane %v45_v13, %v61_v12 }
  0xa7   :  { %v44_v14 = vpop.xlane.xlu0 %43 }
  0xa8   :  { %v46_v15 = vmul.f32 0.00390625, %v44_v14 }
  0xaa   :  { %v66_v17 = vrot.slane %v46_v15, %v61_v12 }
  0xac   :  { %v68_v18 = vsel %vm67_vm1, %v66_v17, %v62_v16 }
  0xad   :  { %284 = vmatmul.mubr.msk.f32.vlgmr.msra.gmra.mrb[0].mxu0 %vm69_vm2, %v68_v18 }
 0x180   :  { %v138_v21 = vpop.f32.mrb[0].mxu0 }
 0x181   :  { %v139_v22 = vadd.f32 %v272_v20, %v138_v21  ;;  %v285_v23 = vpop.f32.mrb[1].mxu0 }
 0x183   :  { %v142_v24 = vmax.f32 %v139_v22, 0.0 }
 0x185   :  { %289 = vmatmul.mubr.msk.f32.vlgmr.msra.gmra.mrb[0].mxu1 %vm151_vm4, %v142_v24 }
 0x258   :  { %v225_v26 = vpop.f32.mrb[0].mxu1 }
 0x259   :  { %v226_v27 = vadd.f32 %v274_v25, %v225_v26  ;;  %v290_v28 = vpop.f32.mrb[1].mxu1 }
 0x25b   :  { %v229_v29 = vadd.f32 3.0, %v226_v27 }
 0x25d   :  { %v230_v30 = vmax.f32 %v229_v29, 0.0 }
 0x25f   :  { %v231_v31 = vmin.f32 %v230_v30, 6.0 }
 0x261   :  { %v232_v33 = vmul.f32 0.16666667, %v231_v31 }
 0x263   :  { %v236_v34 = vrot.slane %v232_v33, %v235_v32  ;;  %v243_v36 = vrot.slane %v232_v33, %v242_v35 }
 0x265   :  { %238 = vbcast.lane.b32.xlu1 %v236_v34, 256 }
 0x269   :  { %245 = vbcast.lane.b32.xlu1 %v243_v36, 256 }
 0x2d7   :  { %v239_v37 = vpop.permute.xlu1 %238 }
 0x2d8   :  { %v247_v38 = vmul.f32 %v239_v37, %v35_v0  ;;  %v248_v39 = vmul.f32 %v239_v37, %v36_v1 }
 0x2da   :  { %251 = vst [vmem:[#allocation5] sm:$0xff] %v247_v38  ;;  %252 = vst [vmem:[#allocation5 + $0x8] sm:$0xff] %v248_v39 }
 0x2db   :  { %v246_v40 = vpop.permute.xlu1 %245 }
 0x2dc   :  { %v249_v41 = vmul.f32 %v246_v40, %v37_v2  ;;  %v250_v42 = vmul.f32 %v246_v40, %v38_v4 }
 0x2de   :  { %253 = vst [vmem:[#allocation5 + $0x10] sm:$0xff] %v249_v41  ;;  %254 = vst [vmem:[#allocation5 + $0x18] sm:$0xff] %v250_v42 }
 0x2df   :  { %330 = shalt.err (!%p327_p12)
}
 0x2e0   :  { %s331_s15 = scalar_lea.hbm %s428_s5, 512 }
 0x2e1   :  { %p332_p13 = scmp.ne.s32.totalorder %s428_s5, %s331_s15  ;;  %p335_p0 = scmp.lt.u32.totalorder %s331_s15, %s428_s5 }
 0x2e3   :  { %p337_p1 = pnand %p335_p0, %p332_p13 }
 0x2e5   :  { %340 = shalt.err (!%p337_p1)
}
 0x2e6   :  { %266 = dma.vmem_to_hbm [thread:$0]  %s261_s3, 512, %s428_s5, [#allocation4], %s346_s28, %s346_s28, %s347_s29  }
 0x2e7   :  { %343 = dma.done.wait [#allocation4], 512  }
 0x2e8   :  { %344 = vsyncadd [#allocation4], 4294966784 }
 0x2e9   :  { %270 = vsyncpa [#allocation3], 1 }
 0x2ea   :  { %271 = vsyncpa [#allocation4], 1 }

</bundles_post_ra>
